<compile_context>
chip_gen: v7x
topology: tpu7x:2x2x1
jax: 0.10.0
libtpu: 0.0.40
codegen_flags: <defaults>
</compile_context>

<pallas_src>
import jax
import jax.numpy as jnp
from jax.experimental import pallas as pl
from jax.experimental.pallas import tpu as pltpu

# VMEM bytes per rotation for f32 inputs: two (TL, 9) input blocks pad 9 -> 128
# lanes (512 B/rot/buffer) and are double-buffered (x4), plus the (TL, 1) output
# block (512 B/rot/buffer, x2)  ->  ~3072 B/rotation.
_VMEM_BYTES_PER_ROT = 3072


def _vmem_capacity_bytes():
    try:
        return int(pltpu.get_tpu_info().vmem_capacity_bytes)
    except Exception:
        return 64 << 20  # v7x-safe fallback (smallest physical VMEM per core)


def _pick_max_tile():
    """Rotations per grid step, sized from physical VMEM (~55% budget)."""
    budget = (_vmem_capacity_bytes() * 11) // 20
    tile = (budget // _VMEM_BYTES_PER_ROT) // 128 * 128
    # ~24K rotations on v5e/v6e (128 MiB VMEM), ~12K on v7x (64 MiB) -> ~0.9-1.8
    # MiB of input DMA per step, well past the per-step overhead crossover.
    return int(max(1024, min(tile, 32768)))


def _geodesic_cos_kernel(m1_ref, m2_ref, cos_ref):
    # m1_ref, m2_ref: (tile, 9) blocks; casts (bf16/f16 -> f32) ride the VPU slot.
    m1 = m1_ref[...].astype(jnp.float32)
    m2 = m2_ref[...].astype(jnp.float32)
    tr = jnp.sum(m1 * m2, axis=1, keepdims=True)      # (tile, 1) trace(R1 @ R2^T)
    cos = (tr - 1.0) * 0.5
    cos = jnp.minimum(cos, 1.0)                        # torch.min(cos, ones)
    cos = jnp.maximum(cos, -1.0)                       # torch.max(cos, -ones)
    cos_ref[...] = cos


def _cos_call(m1, m2, tile, n_rows):
    """Run the kernel over the first `n_rows` rotations of (R, 9) inputs.

    Requires n_rows % tile == 0 and (tile % 8 == 0 or tile == R).
    """
    grid = n_rows // tile
    vmem_limit = min((_vmem_capacity_bytes() * 3) // 4, 100 * 1024 * 1024)
    return pl.pallas_call(
        _geodesic_cos_kernel,
        out_shape=jax.ShapeDtypeStruct((n_rows, 1), jnp.float32),
        grid=(grid,),
        in_specs=[
            pl.BlockSpec((tile, 9), lambda i: (i, 0)),
            pl.BlockSpec((tile, 9), lambda i: (i, 0)),
        ],
        out_specs=pl.BlockSpec((tile, 1), lambda i: (i, 0)),
        compiler_params=pltpu.CompilerParams(
            dimension_semantics=("parallel",),
            vmem_limit_bytes=int(vmem_limit),
        ),
    )(m1, m2)


def _as_rot2d(x):
    x = jnp.asarray(x)
    if x.dtype not in (jnp.float32, jnp.bfloat16, jnp.float16):
        x = x.astype(jnp.float32)
    return jnp.reshape(x, (-1, 9))  # contiguous row-major view of (..., 3, 3)


def geodesic_cos(ypred, ytrue, max_tile=None):
    """Per-rotation cos of the geodesic angle, computed by the Pallas kernel."""
    m1 = _as_rot2d(ypred)
    m2 = _as_rot2d(ytrue)
    n = m1.shape[0]
    if n == 0:
        return jnp.zeros((0,), jnp.float32)

    if max_tile is None:
        max_tile = _pick_max_tile()
    max_tile = max(8, (int(max_tile) // 8) * 8)

    if n <= max_tile:
        # Single block equal to the full array dims -> no padding needed.
        return _cos_call(m1, m2, n, n)[:, 0]

    tile = max_tile
    n_main = (n // tile) * tile
    cos_main = _cos_call(m1, m2, tile, n_main)[:, 0]   # full arrays, no copy/pad
    rem = n - n_main
    if rem == 0:
        return cos_main
    # Remainder (< one tile): tiny slice, single full-array block, no padding.
    cos_tail = _cos_call(m1[n_main:], m2[n_main:], rem, rem)[:, 0]
    return jnp.concatenate([cos_main, cos_tail])


def geodesic_loss(ypred, ytrue, reduction="batchmean", max_tile=None):
    """JAX/Pallas equivalent of GeodesicLoss.forward (eps unused, as in torch)."""
    cos = geodesic_cos(ypred, ytrue, max_tile=max_tile)
    theta = jnp.arccos(cos)
    if reduction == "mean":
        return jnp.mean(theta)
    if reduction == "batchmean":
        # theta is 1-D, so theta.shape[1:] == (); torch.sum(theta, dim=()) reduces
        # over all dims (legacy behavior) and torch.mean of the scalar is a no-op
        # -> batchmean == sum(theta).
        return jnp.sum(theta)
    return theta  # reduction == 'none': per-rotation geodesic angles


def _reference(ypred, ytrue, reduction="batchmean"):
    """Plain-JAX transcription of the PyTorch module, for verification."""
    m1 = jnp.reshape(jnp.asarray(ypred, jnp.float32), (-1, 3, 3))
    m2 = jnp.reshape(jnp.asarray(ytrue, jnp.float32), (-1, 3, 3))
    m = jnp.einsum("bij,bkj->bik", m1, m2)             # bmm(m1, m2^T)
    cos = (m[:, 0, 0] + m[:, 1, 1] + m[:, 2, 2] - 1.0) / 2.0
    cos = jnp.maximum(jnp.minimum(cos, 1.0), -1.0)
    theta = jnp.arccos(cos)
    if reduction == "mean":
        return jnp.mean(theta)
    if reduction == "batchmean":
        return jnp.sum(theta)
    return theta


if __name__ == "__main__":
    key = jax.random.PRNGKey(0)
    k1, k2, k3, k4 = jax.random.split(key, 4)

    # Case 1: batch=2, joints=4 -> 8 rotations (single-block path, default tile).
    yp = jax.random.normal(k1, (2, 4, 3, 3), dtype=jnp.float32) * 0.5
    yt = jax.random.normal(k2, (2, 4, 3, 3), dtype=jnp.float32) * 0.5
    loss = jax.block_until_ready(geodesic_loss(yp, yt, reduction="batchmean"))
    ref = jax.block_until_ready(_reference(yp, yt, reduction="batchmean"))
    theta = jax.block_until_ready(geodesic_loss(yp, yt, reduction="none"))
    theta_ref = _reference(yp, yt, reduction="none")
    if not jnp.allclose(loss, ref, rtol=1e-5, atol=1e-5):
        raise AssertionError(f"batchmean mismatch: {loss} vs {ref}")
    if theta.shape != (8,) or not jnp.allclose(theta, theta_ref, rtol=1e-5, atol=1e-5):
        raise AssertionError("per-rotation theta mismatch")

    # Case 2: 300 rotations with max_tile=128 -> multi-step main grid (256 rows)
    # plus a 44-row remainder call and concatenation; no padding anywhere.
    yp2 = jax.random.normal(k3, (3, 100, 3, 3), dtype=jnp.float32) * 0.5
    yt2 = jax.random.normal(k4, (3, 100, 3, 3), dtype=jnp.float32) * 0.5
    loss2 = jax.block_until_ready(geodesic_loss(yp2, yt2, reduction="mean", max_tile=128))
    ref2 = jax.block_until_ready(_reference(yp2, yt2, reduction="mean"))
    theta2 = jax.block_until_ready(geodesic_loss(yp2, yt2, reduction="none", max_tile=128))
    theta2_ref = _reference(yp2, yt2, reduction="none")
    if not jnp.allclose(loss2, ref2, rtol=1e-5, atol=1e-5):
        raise AssertionError(f"mean mismatch (multi-block): {loss2} vs {ref2}")
    if theta2.shape != (300,) or not jnp.allclose(theta2, theta2_ref, rtol=1e-5, atol=1e-5):
        raise AssertionError("per-rotation theta mismatch (multi-block)")

    # Case 3: bf16 inputs go straight into the kernel (cast to f32 in-kernel).
    yp3 = yp.astype(jnp.bfloat16)
    yt3 = yt.astype(jnp.bfloat16)
    theta3 = jax.block_until_ready(geodesic_loss(yp3, yt3, reduction="none"))
    theta3_ref = _reference(yp3.astype(jnp.float32), yt3.astype(jnp.float32), "none")
    if not jnp.allclose(theta3, theta3_ref, rtol=1e-5, atol=1e-5):
        raise AssertionError("bf16-input theta mismatch")

    print("KERNEL_OK")
</pallas_src>

<mosaic_0001>
module attributes {stable_mosaic.version = 11 : i64} {
  func.func @_geodesic_cos_kernel(%arg0: i32, %arg1: memref<8x9xf32, #tpu.memory_space<vmem>>, %arg2: memref<8x9xf32, #tpu.memory_space<vmem>>, %arg3: memref<8x1xf32, #tpu.memory_space<vmem>>) attributes {dimension_semantics = [#tpu.dimension_semantics<parallel>], iteration_bounds = array<i64: 1>, scalar_prefetch = 0 : i64, scratch_operands = 0 : i64, tpu.core_type = #tpu.core_type<tc>, window_params = [{transform_indices = @transform_0, window_bounds = array<i64: 8, 9>}, {transform_indices = @transform_1, window_bounds = array<i64: 8, 9>}, {transform_indices = @transform_2, window_bounds = array<i64: 8, 1>}]} {
    %c0 = arith.constant 0 : index
    %c0_0 = arith.constant 0 : index
    %0 = vector.load %arg1[%c0, %c0_0] : memref<8x9xf32, #tpu.memory_space<vmem>>, vector<8x9xf32>
    %c0_1 = arith.constant 0 : index
    %c0_2 = arith.constant 0 : index
    %1 = vector.load %arg2[%c0_1, %c0_2] : memref<8x9xf32, #tpu.memory_space<vmem>>, vector<8x9xf32>
    %2 = arith.mulf %0, %1 : vector<8x9xf32>
    %cst = arith.constant dense<0.000000e+00> : vector<8xf32>
    %3 = vector.multi_reduction <add>, %2, %cst [1] : vector<8x9xf32> to vector<8xf32>
    %4 = vector.shape_cast %3 : vector<8xf32> to vector<8x1xf32>
    %cst_3 = arith.constant 1.000000e+00 : f32
    %5 = vector.broadcast %cst_3 : f32 to vector<8x1xf32>
    %6 = arith.subf %4, %5 : vector<8x1xf32>
    %cst_4 = arith.constant 5.000000e-01 : f32
    %7 = vector.broadcast %cst_4 : f32 to vector<8x1xf32>
    %8 = arith.mulf %6, %7 : vector<8x1xf32>
    %cst_5 = arith.constant 1.000000e+00 : f32
    %9 = vector.broadcast %cst_5 : f32 to vector<8x1xf32>
    %10 = arith.minimumf %8, %9 : vector<8x1xf32>
    %cst_6 = arith.constant -1.000000e+00 : f32
    %11 = vector.broadcast %cst_6 : f32 to vector<8x1xf32>
    %12 = arith.maximumf %10, %11 : vector<8x1xf32>
    %c0_7 = arith.constant 0 : index
    %c0_8 = arith.constant 0 : index
    %13 = vector.load %arg3[%c0_7, %c0_8] : memref<8x1xf32, #tpu.memory_space<vmem>>, vector<8x1xf32>
    tpu.vector_store %arg3[%c0_7, %c0_8], %12 {strides = array<i32>} : memref<8x1xf32, #tpu.memory_space<vmem>>, vector<8x1xf32>,
    return
  }
  func.func @transform_0(%arg0: i32) -> (i32, i32) {
    %c0_i32 = arith.constant 0 : i32
    %c0_i32_0 = arith.constant 0 : i32
    return %arg0, %c0_i32 : i32, i32
  }
  func.func @transform_1(%arg0: i32) -> (i32, i32) {
    %c0_i32 = arith.constant 0 : i32
    %c0_i32_0 = arith.constant 0 : i32
    return %arg0, %c0_i32 : i32, i32
  }
  func.func @transform_2(%arg0: i32) -> (i32, i32) {
    %c0_i32 = arith.constant 0 : i32
    %c0_i32_0 = arith.constant 0 : i32
    return %arg0, %c0_i32 : i32, i32
  }
}

</mosaic_0001>

<bundles_post_ra>
// kernel: tpu_custom_call.1
= control target key start
LH: loop header
LB: loop body
LE: loop exit
PB: predicated region body
PF: predicated region fallthrough
CT: control target
= control target key end

     0   :  { %7 = vsyncpa [#allocation3], 0  ;;  %s150_s0 = inlined_call_operand.hbm [shape: f32[8,9], index: 0, kind: input, shape index: {}]   ;;  %s151_s1 = inlined_call_operand.hbm [shape: f32[8,9], index: 1, kind: input, shape index: {}]   ;;  %s152_s2 = inlined_call_operand.vmem [shape: f32[8,1], index: 2, kind: output, shape index: {}]  }
   0x1   :  { %8 = vsyncpa [#allocation5], 0  ;;  %s106_s9 = smov [#allocation2]   ;;  %s107_s11 = smov [#allocation4]  }
   0x2   :  { %s15_s10 = sshll.u32 %s106_s9, 4  ;;  %s25_s12 = sshll.u32 %s107_s11, 4  ;;  %s16_s10 = int_to_ptr.vmem [resolvable:$true] %s15_s10  ;;  %s26_s12 = int_to_ptr.vmem [resolvable:$true] %s25_s12 }
   0x3   :  { %s58_s15 = scalar_lea.hbm %s150_s0, 128 }
   0x4   :  { %p59_p0 = scmp.ne.s32.totalorder %s150_s0, %s58_s15  ;;  %p62_p1 = scmp.lt.u32.totalorder %s58_s15, %s150_s0 }
   0x6   :  { %p64_p2 = pnand %p62_p1, %p59_p0 }
   0x8   :  { %67 = shalt.err (!%p64_p2)
}
   0x9   :  { %s68_s20 = scalar_lea.vmem %s16_s10, 128  ;;  %p73_p4 = scmp.lt.s32.totalorder %s16_s10, %s16_s10 }
   0xa   :  { %p69_p3 = scmp.ne.s32.totalorder %s16_s10, %s68_s20  ;;  %p74_p5 = scmp.lt.s32.totalorder %s68_s20, %s68_s20 }
   0xc   :  { %p75_p6 = por %p74_p5, %p73_p4 }
   0xe   :  { %p76_p7 = pnand %p75_p6, %p69_p3 }
  0x10   :  { %79 = shalt.err (!%p76_p7)
}
  0x11   :  { %18 = dma.hbm_to_vmem [thread:$0]  %s150_s0, 128, %s16_s10, [#allocation3]  }
  0x12   :  { %s80_s25 = scalar_lea.hbm %s151_s1, 128 }
  0x13   :  { %p81_p8 = scmp.ne.s32.totalorder %s151_s1, %s80_s25  ;;  %p84_p9 = scmp.lt.u32.totalorder %s80_s25, %s151_s1 }
  0x15   :  { %p86_p10 = pnand %p84_p9, %p81_p8 }
  0x17   :  { %89 = shalt.err (!%p86_p10)
}
  0x18   :  { %s90_s30 = scalar_lea.vmem %s26_s12, 128  ;;  %p95_p12 = scmp.lt.s32.totalorder %s26_s12, %s26_s12 }
  0x19   :  { %p91_p11 = scmp.ne.s32.totalorder %s26_s12, %s90_s30  ;;  %p96_p13 = scmp.lt.s32.totalorder %s90_s30, %s90_s30 }
  0x1b   :  { %p97_p0 = por %p96_p13, %p95_p12 }
  0x1d   :  { %p98_p1 = pnand %p97_p0, %p91_p11 }
  0x1f   :  { %101 = shalt.err (!%p98_p1)
}
  0x20   :  { %28 = dma.hbm_to_vmem [thread:$0]  %s151_s1, 128, %s26_s12, [#allocation5]  }
  0x21   :  { %102 = dma.done.wait [#allocation3], 128  }
  0x22   :  { %103 = vsyncadd [#allocation3], 4294967168 }
  0x23   :  { %104 = dma.done.wait [#allocation5], 128  }
  0x24   :  { %105 = vsyncadd [#allocation5], 4294967168  ;;  %v35_v0 = vld [vmem:[#allocation2] sm:$0xff]  ;;  %v36_v1 = vld [vmem:[#allocation4] sm:$0xff]  ;;  %vm38_vm0 = vcmask 72704   ;;  %vm46_vm1 = vcmask 7168  }
  0x25   :  { %v37_v2 = vmul.f32 %v36_v1, %v35_v0 }
  0x27   :  { %v39_v3 = vsel %vm38_vm0, %v37_v2, 0.0 }
  0x28   :  { %40 = vadd.xlane.f32.xlu0 %v39_v3 }
  0xb5   :  { %v41_v4 = vpop.xlane.xlu0 %40 }
  0xb6   :  { %v54_v5 = vadd.f32 -1.0, %v41_v4 }
  0xb8   :  { %v43_v6 = vmul.f32 0.5, %v54_v5 }
  0xba   :  { %v55_v7 = vclamps-f32 %v43_v6, 1.0 }
  0xbc   :  { %47 = vst.msk [vmem:[%s152_s2] sm:$0xff] %vm46_vm1, %v55_v7 }
  0xbd   :  { %52 = vsyncpa [#allocation3], 1 }
  0xbe   :  { %53 = vsyncpa [#allocation5], 1 }

</bundles_post_ra>
